<compile_context>
chip_gen: v5e
topology: v5e:2x2
jax: 0.10.0
libtpu: 0.0.40
codegen_flags: <defaults>
</compile_context>

<pallas_src>
from functools import lru_cache, partial
import math
import re

import numpy as np
import jax
import jax.numpy as jnp
from jax.experimental import pallas as pl
from jax.experimental.pallas import tpu as pltpu

_MIB = 1024 * 1024


# ----------------------------- chip-aware config ------------------------------

def _tpu_generation():
    try:
        kind = jax.devices()[0].device_kind
    except Exception:
        return 0
    m = re.search(r"(\d+)", kind)
    return int(m.group(1)) if m else 0


@lru_cache(maxsize=None)
def _chip_config():
    gen = _tpu_generation()
    if gen >= 7:
        # v7x: 64 MiB VMEM per TC, ~3.2 TB/s HBM, 2 TensorCores.
        return dict(gen=gen, tile_bytes=4 * _MIB, vmem_limit=48 * _MIB,
                    min_steps=8, max_fold_lanes=512)
    if gen in (5, 6):
        # v5e/v6e: 128 MiB physical VMEM, single TensorCore.
        return dict(gen=gen, tile_bytes=6 * _MIB, vmem_limit=80 * _MIB,
                    min_steps=1, max_fold_lanes=512 if gen >= 6 else 128)
    # Unknown / older chips: conservative defaults.
    return dict(gen=gen, tile_bytes=2 * _MIB, vmem_limit=32 * _MIB,
                min_steps=1, max_fold_lanes=128)


def _sublane_quantum(dtype):
    # Row-axis (sublane) pack: f32 -> 8, bf16 -> 16, int8/fp8 -> 32.
    return max(8, 32 // jnp.dtype(dtype).itemsize)


def _pick_block(n, cap, quantum):
    """Largest block <= min(cap, n) that is n itself or a multiple of `quantum`,
    preferring exact divisors of n (avoids ragged boundary blocks)."""
    cap = min(cap, n)
    if cap >= n:
        return n
    t = max(quantum, (cap // quantum) * quantum)
    d = t
    while d >= quantum:
        if n % d == 0:
            return d          # exact divisor -> no masked boundary block
        d -= quantum
    return t                  # ragged tail handled by Pallas boundary masking


def _split_for_cores(n, blk, quantum, min_steps):
    """Shrink the block (keeping divisor preference) so the grid has at least
    `min_steps` steps -- only used on multi-TensorCore chips (v7x)."""
    if min_steps <= 1 or pl.cdiv(n, blk) >= min_steps:
        return blk
    target = max(quantum, n // min_steps)
    return _pick_block(n, target, quantum)


@lru_cache(maxsize=None)
def _segment_mask(c, g):
    """(GC, GC) block-diagonal 0/1 matrix: 1 where lanes belong to the same
    C-wide channel segment.  Cached per (C, G); becomes a compile-time constant."""
    gc = c * g
    seg = np.arange(gc, dtype=np.int64) // c
    return jnp.asarray((seg[:, None] == seg[None, :]).astype(np.float32))


# ----------------------------- kernels ----------------------------------------

def _ln_last_kernel(x_ref, w_ref, b_ref, o_ref, *, eps):
    # x_ref: (TM, C)   w_ref/b_ref: (1, C) f32
    x = x_ref[...].astype(jnp.float32)
    mean = jnp.mean(x, axis=-1, keepdims=True)
    xc = x - mean
    var = jnp.mean(xc * xc, axis=-1, keepdims=True)
    inv = jax.lax.rsqrt(var + eps)
    o_ref[...] = (xc * inv * w_ref[...] + b_ref[...]).astype(o_ref.dtype)


def _ln_last_folded_kernel(x_ref, m_ref, w_ref, b_ref, o_ref, *, inv_c, eps):
    # x_ref: (TM, GC) -- G rows of C channels folded into one dense lane slab.
    # m_ref: (GC, GC) block-diagonal 0/1 matrix; x @ m gives, in every lane, the
    # sum over its own C-segment (already broadcast), using the otherwise-idle
    # MXU and keeping loads/stores lane-dense.  Centered variance for stability.
    x = x_ref[...].astype(jnp.float32)
    m = m_ref[...]
    mean = jnp.dot(x, m, preferred_element_type=jnp.float32) * inv_c
    xc = x - mean
    var = jnp.dot(xc * xc, m, preferred_element_type=jnp.float32) * inv_c
    inv = jax.lax.rsqrt(var + eps)
    o_ref[...] = (xc * inv * w_ref[...] + b_ref[...]).astype(o_ref.dtype)


def _ln_first_kernel(x_ref, w_ref, b_ref, o_ref, *, eps):
    # x_ref: (1, C, TS)   w_ref/b_ref: (1, C, 1) f32; reduce over channel axis 1
    x = x_ref[...].astype(jnp.float32)
    mean = jnp.mean(x, axis=1, keepdims=True)
    xc = x - mean
    var = jnp.mean(xc * xc, axis=1, keepdims=True)
    inv = jax.lax.rsqrt(var + eps)
    o_ref[...] = (xc * inv * w_ref[...] + b_ref[...]).astype(o_ref.dtype)


# ----------------------------- wrappers ----------------------------------------

def layernorm_channels_last(x, weight, bias, eps=1e-6):
    """x: (..., C); normalize over the last axis."""
    cfg = _chip_config()
    C = x.shape[-1]
    R = math.prod(x.shape[:-1]) if x.ndim > 1 else 1
    itemsize = jnp.dtype(x.dtype).itemsize
    quantum = _sublane_quantum(x.dtype)

    w = weight.astype(jnp.float32)
    b = bias.astype(jnp.float32)

    # Fold G consecutive rows into one lane slab whose width GC = C*G is a
    # multiple of 128 (lane-dense loads/stores).  G = 128 / gcd(C, 128).
    G = 128 // math.gcd(C, 128)
    GC = C * G
    fold = (G > 1) and (GC <= cfg["max_fold_lanes"]) and (R % G == 0)

    if fold:
        Rg = R // G
        x2 = x.reshape(Rg, GC)                 # same row-major bytes: free reshape
        mmat = _segment_mask(C, G)             # cached per (C, G)
        w2 = jnp.tile(w, G).reshape(1, GC)
        b2 = jnp.tile(b, G).reshape(1, GC)
        lane = GC
    else:
        Rg = R
        x2 = x.reshape(Rg, C)
        w2 = w.reshape(1, C)
        b2 = b.reshape(1, C)
        lane = C

    row_bytes = lane * itemsize                # actual HBM bytes per row
    rows_cap = max(quantum, cfg["tile_bytes"] // max(row_bytes, 1))
    tm = _pick_block(Rg, rows_cap, quantum)
    tm = _split_for_cores(Rg, tm, quantum, cfg["min_steps"])

    grid = (pl.cdiv(Rg, tm),)
    cparams = pltpu.CompilerParams(
        dimension_semantics=("parallel",),
        vmem_limit_bytes=cfg["vmem_limit"],
    )
    mm_flops = (4 * GC * x.size) if fold else 0
    cost = pl.CostEstimate(
        flops=10 * x.size + mm_flops,
        transcendentals=R,
        bytes_accessed=2 * x.size * itemsize + 2 * C * 4,
    )

    if fold:
        out = pl.pallas_call(
            partial(_ln_last_folded_kernel, inv_c=1.0 / C, eps=eps),
            out_shape=jax.ShapeDtypeStruct((Rg, GC), x.dtype),
            grid=grid,
            in_specs=[
                pl.BlockSpec((tm, GC), lambda i: (i, 0)),
                pl.BlockSpec((GC, GC), lambda i: (0, 0)),
                pl.BlockSpec((1, GC), lambda i: (0, 0)),
                pl.BlockSpec((1, GC), lambda i: (0, 0)),
            ],
            out_specs=pl.BlockSpec((tm, GC), lambda i: (i, 0)),
            compiler_params=cparams,
            cost_estimate=cost,
        )(x2, mmat, w2, b2)
    else:
        out = pl.pallas_call(
            partial(_ln_last_kernel, eps=eps),
            out_shape=jax.ShapeDtypeStruct((Rg, C), x.dtype),
            grid=grid,
            in_specs=[
                pl.BlockSpec((tm, C), lambda i: (i, 0)),
                pl.BlockSpec((1, C), lambda i: (0, 0)),
                pl.BlockSpec((1, C), lambda i: (0, 0)),
            ],
            out_specs=pl.BlockSpec((tm, C), lambda i: (i, 0)),
            compiler_params=cparams,
            cost_estimate=cost,
        )(x2, w2, b2)

    return out.reshape(x.shape)


def layernorm_channels_first(x, weight, bias, eps=1e-6):
    """x: (B, C, *spatial); normalize over axis 1 (channels)."""
    cfg = _chip_config()
    B, C = x.shape[0], x.shape[1]
    S = math.prod(x.shape[2:]) if x.ndim > 2 else 1
    itemsize = jnp.dtype(x.dtype).itemsize

    x3 = x.reshape(B, C, S)                     # free reshape, no pad
    w3 = weight.astype(jnp.float32).reshape(1, C, 1)
    b3 = bias.astype(jnp.float32).reshape(1, C, 1)

    col_bytes = C * itemsize                    # actual HBM bytes per lane column
    cols_cap = max(128, cfg["tile_bytes"] // max(col_bytes, 1))
    ts = _pick_block(S, cols_cap, 128)
    # v7x: ask for >= min_steps total grid steps so both TensorCores get work.
    per_b = -(-cfg["min_steps"] // max(B, 1))
    ts = _split_for_cores(S, ts, 128, per_b)

    grid = (B, pl.cdiv(S, ts))
    cparams = pltpu.CompilerParams(
        dimension_semantics=("parallel", "parallel"),
        vmem_limit_bytes=cfg["vmem_limit"],
    )
    cost = pl.CostEstimate(
        flops=10 * x.size,
        transcendentals=B * S,
        bytes_accessed=2 * x.size * itemsize + 2 * C * 4,
    )

    out = pl.pallas_call(
        partial(_ln_first_kernel, eps=eps),
        out_shape=jax.ShapeDtypeStruct((B, C, S), x.dtype),
        grid=grid,
        in_specs=[
            pl.BlockSpec((1, C, ts), lambda bi, si: (bi, 0, si)),
            pl.BlockSpec((1, C, 1), lambda bi, si: (0, 0, 0)),
            pl.BlockSpec((1, C, 1), lambda bi, si: (0, 0, 0)),
        ],
        out_specs=pl.BlockSpec((1, C, ts), lambda bi, si: (bi, 0, si)),
        compiler_params=cparams,
        cost_estimate=cost,
    )(x3, w3, b3)

    return out.reshape(x.shape)


# ----------------------------- module-equivalent --------------------------------

class LayerNormPallas:
    def __init__(self, normalized_shape, eps=1e-6, data_format="channels_last"):
        if data_format not in ["channels_last", "channels_first"]:
            raise NotImplementedError
        # Pre-cast once so the per-call wrapper does no redundant host work.
        self.weight = jnp.ones((normalized_shape,), dtype=jnp.float32)
        self.bias = jnp.zeros((normalized_shape,), dtype=jnp.float32)
        self.eps = eps
        self.data_format = data_format

    def __call__(self, x):
        if self.data_format == "channels_last":
            return layernorm_channels_last(x, self.weight, self.bias, self.eps)
        else:
            return layernorm_channels_first(x, self.weight, self.bias, self.eps)


# ----------------------------- references & test --------------------------------

def _ref_channels_last(x, w, b, eps):
    xf = x.astype(jnp.float32)
    mean = jnp.mean(xf, axis=-1, keepdims=True)
    var = jnp.mean((xf - mean) ** 2, axis=-1, keepdims=True)
    return ((xf - mean) / jnp.sqrt(var + eps) * w + b).astype(x.dtype)


def _ref_channels_first(x, w, b, eps):
    xf = x.astype(jnp.float32)
    mean = jnp.mean(xf, axis=1, keepdims=True)
    var = jnp.mean((xf - mean) ** 2, axis=1, keepdims=True)
    xn = (xf - mean) / jnp.sqrt(var + eps)
    bshape = (1, -1) + (1,) * (x.ndim - 2)
    return (w.reshape(bshape) * xn + b.reshape(bshape)).astype(x.dtype)


if __name__ == "__main__":
    key = jax.random.PRNGKey(0)
    k1, k2, k3, k4, k5 = jax.random.split(key, 5)

    # channels_last, small C that divides 128 -> folded GC=128 lane-dense path
    C1 = 32
    x_cl = jax.random.normal(k1, (2, 4, 8, 8, C1), dtype=jnp.float32)
    ln_last = LayerNormPallas(C1, eps=1e-6, data_format="channels_last")
    y_last = ln_last(x_cl)

    # channels_last, C=96 (ConvNeXt-T stem width) -> generalized GC=384 fold
    # on v6e/v7x, direct path on v5e/unknown.
    C2 = 96
    x_cl2 = jax.random.normal(k3, (2, 3, 4, 4, C2), dtype=jnp.float32)
    ln_last2 = LayerNormPallas(C2, eps=1e-6, data_format="channels_last")
    y_last2 = ln_last2(x_cl2)

    # channels_first, 5-D NCDHW
    x_cf = jax.random.normal(k2, (2, C1, 4, 8, 8), dtype=jnp.float32)
    ln_first = LayerNormPallas(C1, eps=1e-6, data_format="channels_first")
    y_first = ln_first(x_cf)

    # non-trivial weight/bias through the functional wrappers
    wr = 1.0 + 0.5 * jax.random.normal(k4, (C1,), dtype=jnp.float32)
    br = 0.1 * jax.random.normal(k5, (C1,), dtype=jnp.float32)
    y_last_wb = layernorm_channels_last(x_cl, wr, br, 1e-6)
    y_first_wb = layernorm_channels_first(x_cf, wr, br, 1e-6)

    # bf16 input exercises the dtype-aware sublane quantum / block sizing
    x_bf16 = x_cl.astype(jnp.bfloat16)
    y_bf16 = layernorm_channels_last(x_bf16, wr, br, 1e-6)

    # mean-offset input verifies the folded path's MXU matmul is full f32 precision
    x_off = x_cl + 5.0
    y_off = layernorm_channels_last(x_off, wr, br, 1e-6)

    jax.block_until_ready((y_last, y_last2, y_first, y_last_wb, y_first_wb,
                           y_bf16, y_off))

    ref_last = _ref_channels_last(x_cl, ln_last.weight, ln_last.bias, 1e-6)
    ref_last2 = _ref_channels_last(x_cl2, ln_last2.weight, ln_last2.bias, 1e-6)
    ref_first = _ref_channels_first(x_cf, ln_first.weight, ln_first.bias, 1e-6)
    ref_last_wb = _ref_channels_last(x_cl, wr, br, 1e-6)
    ref_first_wb = _ref_channels_first(x_cf, wr, br, 1e-6)
    ref_bf16 = _ref_channels_last(x_bf16, wr, br, 1e-6)
    ref_off = _ref_channels_last(x_off, wr, br, 1e-6)

    assert y_last.shape == x_cl.shape and y_last.dtype == x_cl.dtype
    assert y_last2.shape == x_cl2.shape and y_last2.dtype == x_cl2.dtype
    assert y_first.shape == x_cf.shape and y_first.dtype == x_cf.dtype
    assert y_bf16.shape == x_bf16.shape and y_bf16.dtype == x_bf16.dtype
    assert jnp.allclose(y_last, ref_last, rtol=2e-5, atol=2e-5)
    assert jnp.allclose(y_last2, ref_last2, rtol=2e-5, atol=2e-5)
    assert jnp.allclose(y_first, ref_first, rtol=2e-5, atol=2e-5)
    assert jnp.allclose(y_last_wb, ref_last_wb, rtol=2e-5, atol=2e-5)
    assert jnp.allclose(y_first_wb, ref_first_wb, rtol=2e-5, atol=2e-5)
    assert jnp.allclose(y_bf16.astype(jnp.float32), ref_bf16.astype(jnp.float32),
                        rtol=2e-2, atol=2e-2)
    assert jnp.allclose(y_off, ref_off, rtol=1e-4, atol=1e-4)

    print("KERNEL_OK")
</pallas_src>

<mosaic_0001>
module attributes {stable_mosaic.version = 11 : i64} {
  func.func @_ln_last_folded_kernel(%arg0: i32, %arg1: memref<128x128xf32, #tpu.memory_space<vmem>>, %arg2: memref<128x128xf32, #tpu.memory_space<vmem>>, %arg3: memref<1x128xf32, #tpu.memory_space<vmem>>, %arg4: memref<1x128xf32, #tpu.memory_space<vmem>>, %arg5: memref<128x128xf32, #tpu.memory_space<vmem>>) attributes {dimension_semantics = [#tpu.dimension_semantics<parallel>], iteration_bounds = array<i64: 1>, scalar_prefetch = 0 : i64, scratch_operands = 0 : i64, tpu.core_type = #tpu.core_type<tc>, window_params = [{transform_indices = @transform_0, window_bounds = array<i64: 128, 128>}, {pipeline_mode = #tpu.pipeline_mode<synchronous>, transform_indices = @transform_1, window_bounds = array<i64: 128, 128>}, {pipeline_mode = #tpu.pipeline_mode<synchronous>, transform_indices = @transform_2, window_bounds = array<i64: 1, 128>}, {pipeline_mode = #tpu.pipeline_mode<synchronous>, transform_indices = @transform_3, window_bounds = array<i64: 1, 128>}, {transform_indices = @transform_4, window_bounds = array<i64: 128, 128>}]} {
    %c0 = arith.constant 0 : index
    %c0_0 = arith.constant 0 : index
    %0 = vector.load %arg1[%c0, %c0_0] : memref<128x128xf32, #tpu.memory_space<vmem>>, vector<128x128xf32>
    %c0_1 = arith.constant 0 : index
    %c0_2 = arith.constant 0 : index
    %1 = vector.load %arg2[%c0_1, %c0_2] : memref<128x128xf32, #tpu.memory_space<vmem>>, vector<128x128xf32>
    %cst = arith.constant dense<0.000000e+00> : vector<128x128xf32>
    %2 = tpu.matmul %0, %1, %cst {dimension_numbers = #tpu.dot_dimension_numbers<[1], [0], [0], [1], [0, 0, 1, 1], [], []>} : vector<128x128xf32>, vector<128x128xf32>, vector<128x128xf32> -> vector<128x128xf32>
    %cst_3 = arith.constant 3.125000e-02 : f32
    %3 = vector.broadcast %cst_3 : f32 to vector<128x128xf32>
    %4 = arith.mulf %2, %3 : vector<128x128xf32>
    %5 = arith.subf %0, %4 : vector<128x128xf32>
    %6 = arith.mulf %5, %5 : vector<128x128xf32>
    %cst_4 = arith.constant dense<0.000000e+00> : vector<128x128xf32>
    %7 = tpu.matmul %6, %1, %cst_4 {dimension_numbers = #tpu.dot_dimension_numbers<[1], [0], [0], [1], [0, 0, 1, 1], [], []>} : vector<128x128xf32>, vector<128x128xf32>, vector<128x128xf32> -> vector<128x128xf32>
    %cst_5 = arith.constant 3.125000e-02 : f32
    %8 = vector.broadcast %cst_5 : f32 to vector<128x128xf32>
    %9 = arith.mulf %7, %8 : vector<128x128xf32>
    %cst_6 = arith.constant 9.99999997E-7 : f32
    %10 = vector.broadcast %cst_6 : f32 to vector<128x128xf32>
    %11 = arith.addf %9, %10 : vector<128x128xf32>
    %12 = math.rsqrt %11 : vector<128x128xf32>
    %13 = arith.mulf %5, %12 : vector<128x128xf32>
    %c0_7 = arith.constant 0 : index
    %c0_8 = arith.constant 0 : index
    %14 = vector.load %arg3[%c0_7, %c0_8] : memref<1x128xf32, #tpu.memory_space<vmem>>, vector<1x128xf32>
    %15 = vector.broadcast %14 : vector<1x128xf32> to vector<128x128xf32>
    %16 = arith.mulf %13, %15 : vector<128x128xf32>
    %c0_9 = arith.constant 0 : index
    %c0_10 = arith.constant 0 : index
    %17 = vector.load %arg4[%c0_9, %c0_10] : memref<1x128xf32, #tpu.memory_space<vmem>>, vector<1x128xf32>
    %18 = vector.broadcast %17 : vector<1x128xf32> to vector<128x128xf32>
    %19 = arith.addf %16, %18 : vector<128x128xf32>
    %c0_11 = arith.constant 0 : index
    %c0_12 = arith.constant 0 : index
    %20 = vector.load %arg5[%c0_11, %c0_12] : memref<128x128xf32, #tpu.memory_space<vmem>>, vector<128x128xf32>
    tpu.vector_store %arg5[%c0_11, %c0_12], %19 {strides = array<i32>} : memref<128x128xf32, #tpu.memory_space<vmem>>, vector<128x128xf32>,
    return
  }
  func.func @transform_0(%arg0: i32) -> (i32, i32) {
    %c0_i32 = arith.constant 0 : i32
    %c0_i32_0 = arith.constant 0 : i32
    return %arg0, %c0_i32 : i32, i32
  }
  func.func @transform_1(%arg0: i32) -> (i32, i32) {
    %c0_i32 = arith.constant 0 : i32
    %c0_i32_0 = arith.constant 0 : i32
    %c0_i32_1 = arith.constant 0 : i32
    return %c0_i32, %c0_i32_0 : i32, i32
  }
  func.func @transform_2(%arg0: i32) -> (i32, i32) {
    %c0_i32 = arith.constant 0 : i32
    %c0_i32_0 = arith.constant 0 : i32
    %c0_i32_1 = arith.constant 0 : i32
    return %c0_i32, %c0_i32_0 : i32, i32
  }
  func.func @transform_3(%arg0: i32) -> (i32, i32) {
    %c0_i32 = arith.constant 0 : i32
    %c0_i32_0 = arith.constant 0 : i32
    %c0_i32_1 = arith.constant 0 : i32
    return %c0_i32, %c0_i32_0 : i32, i32
  }
  func.func @transform_4(%arg0: i32) -> (i32, i32) {
    %c0_i32 = arith.constant 0 : i32
    %c0_i32_0 = arith.constant 0 : i32
    return %arg0, %c0_i32 : i32, i32
  }
}

</mosaic_0001>

<bundles_post_ra>
// kernel: tpu_custom_call.1
= control target key start
LH: loop header
LB: loop body
LE: loop exit
PB: predicated region body
PF: predicated region fallthrough
CT: control target
= control target key end

     0   :  { %9 = vsyncpa [#allocation3], 0  ;;  %s957_s0 = inlined_call_operand.hbm [shape: f32[128,128], index: 0, kind: input, shape index: {}]   ;;  %s958_s1 = inlined_call_operand.hbm [shape: f32[128,128], index: 1, kind: input, shape index: {}]   ;;  %s959_s2 = inlined_call_operand.vmem [shape: f32[1,128], index: 2, kind: input, shape index: {}]   ;;  %s960_s3 = inlined_call_operand.vmem [shape: f32[1,128], index: 3, kind: input, shape index: {}]   ;;  %s961_s4 = inlined_call_operand.hbm [shape: f32[128,128], index: 4, kind: output, shape index: {}]  }
   0x1   :  { %10 = vsyncpa [#allocation6], 0 }
   0x2   :  { %11 = vsyncpa [#allocation4], 0  ;;  %s16_s17 = sshll.u32 %s957_s0, 4  ;;  %s693_s18 = smov [#allocation2]   ;;  %s17_s17 = int_to_ptr.hbm [resolvable:$true] %s16_s17 }
   0x3   :  { %s18_s19 = sshll.u32 %s693_s18, 4  ;;  %s29_s22 = sshll.u32 %s958_s1, 4  ;;  %s19_s19 = int_to_ptr.vmem [resolvable:$true] %s18_s19  ;;  %s30_s22 = int_to_ptr.hbm [resolvable:$true] %s29_s22 }
   0x4   :  { %s694_s23 = smov 128   ;;  %s695_s24 = smov 8  }
   0x5   :  { %24 = dma.hbm_to_vmem [thread:$0]  %s17_s17, 2048, %s19_s19, [#allocation3], %s694_s23, %s694_s23, %s695_s24  }
   0x6   :  { %s696_s25 = smov [#allocation5]  }
   0x7   :  { %s31_s26 = sshll.u32 %s696_s25, 4  ;;  %s32_s26 = int_to_ptr.vmem [resolvable:$true] %s31_s26 }
   0x8   :  { %37 = dma.hbm_to_vmem [thread:$0]  %s30_s22, 2048, %s32_s26, [#allocation6], %s694_s23, %s694_s23, %s695_s24  }
   0x9   :  { %687 = dma.done.wait [#allocation3], 2048  }
   0xa   :  { %688 = vsyncadd [#allocation3], 4294965248 }
   0xb   :  { %689 = dma.done.wait [#allocation6], 2048  }
   0xc   :  { %690 = vsyncadd [#allocation6], 4294965248  ;;  %v81_v0 = vld [vmem:[#allocation5 + $0x78] sm:$0xff]  ;;  %v80_v1 = vld [vmem:[#allocation5 + $0x70] sm:$0xff]  ;;  %s530_s5 = sshll.u32 %s961_s4, 4  ;;  %s531_s5 = int_to_ptr.hbm [resolvable:$true] %s530_s5 }
   0xd   :  { %82 = vmatpush.msra.mxu0 %v81_v0  ;;  %544 = vmatpush.msra.mxu2 %v81_v0  ;;  %v79_v2 = vld [vmem:[#allocation5 + $0x68] sm:$0xff]  ;;  %v78_v3 = vld [vmem:[#allocation5 + $0x60] sm:$0xff]  ;;  %v77_v4 = vld [vmem:[#allocation5 + $0x58] sm:$0xff] }
   0xe   :  { %195 = vmatpush.msra.mxu1 %v81_v0  ;;  %560 = vmatpush.msra.mxu3 %v81_v0  ;;  %v76_v5 = vld [vmem:[#allocation5 + $0x50] sm:$0xff]  ;;  %v75_v6 = vld [vmem:[#allocation5 + $0x48] sm:$0xff]  ;;  %v74_v7 = vld [vmem:[#allocation5 + $0x40] sm:$0xff] }
   0xf   :  { %83 = vmatpush.msra.mxu0 %v80_v1  ;;  %545 = vmatpush.msra.mxu2 %v80_v1  ;;  %v73_v8 = vld [vmem:[#allocation5 + $0x38] sm:$0xff]  ;;  %v72_v9 = vld [vmem:[#allocation5 + $0x30] sm:$0xff]  ;;  %v71_v10 = vld [vmem:[#allocation5 + $0x28] sm:$0xff] }
  0x10   :  { %196 = vmatpush.msra.mxu1 %v80_v1  ;;  %561 = vmatpush.msra.mxu3 %v80_v1  ;;  %v70_v11 = vld [vmem:[#allocation5 + $0x20] sm:$0xff]  ;;  %v69_v12 = vld [vmem:[#allocation5 + $0x18] sm:$0xff]  ;;  %v68_v13 = vld [vmem:[#allocation5 + $0x10] sm:$0xff] }
  0x11   :  { %84 = vmatpush.msra.mxu0 %v79_v2  ;;  %546 = vmatpush.msra.mxu2 %v79_v2  ;;  %v67_v14 = vld [vmem:[#allocation5 + $0x8] sm:$0xff]  ;;  %v66_v15 = vld [vmem:[#allocation5] sm:$0xff]  ;;  %v52_v20 = vld [vmem:[#allocation2 + $0x10] sm:$0xff] }
  0x12   :  { %197 = vmatpush.msra.mxu1 %v79_v2  ;;  %562 = vmatpush.msra.mxu3 %v79_v2  ;;  %v50_v16 = vld [vmem:[#allocation2] sm:$0xff]  ;;  %v51_v18 = vld [vmem:[#allocation2 + $0x8] sm:$0xff]  ;;  %v60_v21 = vld [vmem:[#allocation2 + $0x50] sm:$0xff] }
  0x13   :  { %85 = vmatpush.msra.mxu0 %v78_v3  ;;  %547 = vmatpush.msra.mxu2 %v78_v3  ;;  %v58_v17 = vld [vmem:[#allocation2 + $0x40] sm:$0xff]  ;;  %v59_v19 = vld [vmem:[#allocation2 + $0x48] sm:$0xff]  ;;  %v53_v22 = vld [vmem:[#allocation2 + $0x18] sm:$0xff] }
  0x14   :  { %198 = vmatpush.msra.mxu1 %v78_v3  ;;  %563 = vmatpush.msra.mxu3 %v78_v3  ;;  %v61_v23 = vld [vmem:[#allocation2 + $0x58] sm:$0xff]  ;;  %v54_v24 = vld [vmem:[#allocation2 + $0x20] sm:$0xff]  ;;  %v55_v26 = vld [vmem:[#allocation2 + $0x28] sm:$0xff] }
  0x15   :  { %86 = vmatpush.msra.mxu0 %v77_v4  ;;  %548 = vmatpush.msra.mxu2 %v77_v4  ;;  %v735_v25 = vld [vmem:[#allocation2 + $0x60] sm:$0xff]  ;;  %v738_v27 = vld [vmem:[#allocation2 + $0x68] sm:$0xff]  ;;  %v741_v28 = vld [vmem:[#allocation2 + $0x30] sm:$0xff] }
  0x16   :  { %199 = vmatpush.msra.mxu1 %v77_v4  ;;  %564 = vmatpush.msra.mxu3 %v77_v4  ;;  %v743_v29 = vld [vmem:[#allocation2 + $0x70] sm:$0xff]  ;;  %v747_v30 = vld [vmem:[#allocation2 + $0x38] sm:$0xff] }
  0x17   :  { %87 = vmatpush.msra.mxu0 %v76_v5  ;;  %549 = vmatpush.msra.mxu2 %v76_v5  ;;  %v749_v31 = vld [vmem:[#allocation2 + $0x78] sm:$0xff] }
  0x18   :  { %200 = vmatpush.msra.mxu1 %v76_v5  ;;  %565 = vmatpush.msra.mxu3 %v76_v5 }
  0x19   :  { %88 = vmatpush.msra.mxu0 %v75_v6  ;;  %550 = vmatpush.msra.mxu2 %v75_v6 }
  0x1a   :  { %201 = vmatpush.msra.mxu1 %v75_v6  ;;  %566 = vmatpush.msra.mxu3 %v75_v6 }
  0x1b   :  { %89 = vmatpush.msra.mxu0 %v74_v7  ;;  %551 = vmatpush.msra.mxu2 %v74_v7 }
  0x1c   :  { %202 = vmatpush.msra.mxu1 %v74_v7  ;;  %567 = vmatpush.msra.mxu3 %v74_v7 }
  0x1d   :  { %90 = vmatpush.msra.mxu0 %v73_v8  ;;  %552 = vmatpush.msra.mxu2 %v73_v8 }
  0x1e   :  { %203 = vmatpush.msra.mxu1 %v73_v8  ;;  %568 = vmatpush.msra.mxu3 %v73_v8 }
  0x1f   :  { %91 = vmatpush.msra.mxu0 %v72_v9  ;;  %553 = vmatpush.msra.mxu2 %v72_v9 }
  0x20   :  { %204 = vmatpush.msra.mxu1 %v72_v9  ;;  %569 = vmatpush.msra.mxu3 %v72_v9 }
  0x21   :  { %92 = vmatpush.msra.mxu0 %v71_v10  ;;  %554 = vmatpush.msra.mxu2 %v71_v10 }
  0x22   :  { %205 = vmatpush.msra.mxu1 %v71_v10  ;;  %570 = vmatpush.msra.mxu3 %v71_v10 }
  0x23   :  { %93 = vmatpush.msra.mxu0 %v70_v11  ;;  %555 = vmatpush.msra.mxu2 %v70_v11 }
  0x24   :  { %206 = vmatpush.msra.mxu1 %v70_v11  ;;  %571 = vmatpush.msra.mxu3 %v70_v11 }
  0x25   :  { %94 = vmatpush.msra.mxu0 %v69_v12  ;;  %556 = vmatpush.msra.mxu2 %v69_v12 }
  0x26   :  { %207 = vmatpush.msra.mxu1 %v69_v12  ;;  %572 = vmatpush.msra.mxu3 %v69_v12 }
  0x27   :  { %95 = vmatpush.msra.mxu0 %v68_v13  ;;  %557 = vmatpush.msra.mxu2 %v68_v13 }
  0x28   :  { %208 = vmatpush.msra.mxu1 %v68_v13  ;;  %573 = vmatpush.msra.mxu3 %v68_v13 }
  0x29   :  { %96 = vmatpush.msra.mxu0 %v67_v14  ;;  %558 = vmatpush.msra.mxu2 %v67_v14 }
  0x2a   :  { %209 = vmatpush.msra.mxu1 %v67_v14  ;;  %574 = vmatpush.msra.mxu3 %v67_v14 }
  0x2b   :  { %97 = vmatpush.msra.mxu0 %v66_v15  ;;  %559 = vmatpush.msra.mxu2 %v66_v15 }
  0x2c   :  { %98 = vmatmul.f32.vlgmr.msra.gmra.mxu0 %v50_v16  ;;  %122 = vmatmul.f32.vlgmr.msra.gmra.mxu2 %v58_v17 }
  0x2d   :  { %210 = vmatpush.msra.mxu1 %v66_v15  ;;  %575 = vmatpush.msra.mxu3 %v66_v15 }
  0x34   :  { %101 = vmatmul.f32.gmra.mxu0 %v51_v18  ;;  %125 = vmatmul.f32.gmra.mxu2 %v59_v19 }
  0x3c   :  { %104 = vmatmul.f32.gmra.mxu0 %v52_v20  ;;  %128 = vmatmul.f32.gmra.mxu2 %v60_v21 }
  0x44   :  { %107 = vmatmul.f32.gmra.mxu0 %v53_v22  ;;  %131 = vmatmul.f32.gmra.mxu2 %v61_v23 }
  0x4c   :  { %110 = vmatmul.f32.gmra.mxu0 %v54_v24  ;;  %134 = vmatmul.f32.gmra.mxu2 %v735_v25 }
  0x54   :  { %113 = vmatmul.f32.gmra.mxu0 %v55_v26  ;;  %137 = vmatmul.f32.gmra.mxu2 %v738_v27 }
  0x5c   :  { %116 = vmatmul.f32.gmra.mxu0 %v741_v28  ;;  %140 = vmatmul.f32.gmra.mxu2 %v743_v29 }
  0x64   :  { %119 = vmatmul.f32.gmra.mxu0 %v747_v30  ;;  %143 = vmatmul.f32.gmra.mxu2 %v749_v31 }
  0xa9   :  { %v99_v32 = vpop.f32.mrf.mxu0 }
  0xaa   :  { %v147_v33 = vmul.f32 0.03125, %v99_v32 }
  0xac   :  { %v753_v34 = vsub.f32 %v50_v16, %v147_v33 }
  0xae   :  { %v179_v35 = vmul.f32 %v753_v34, %v753_v34 }
  0xaf   :  { %v123_v36 = vpop.f32.mrf.mxu2 }
  0xb0   :  { %v155_v37 = vmul.f32 0.03125, %v123_v36  ;;  %211 = vmatmul.f32.vlgmr.msra.gmra.mxu1 %v179_v35 }
  0xb1   :  { %v102_v38 = vpop.f32.mrf.mxu0 }
  0xb2   :  { %v757_v39 = vsub.f32 %v58_v17, %v155_v37  ;;  %v148_v40 = vmul.f32 0.03125, %v102_v38 }
  0xb4   :  { %v759_v41 = vsub.f32 %v51_v18, %v148_v40  ;;  %v187_v42 = vmul.f32 %v757_v39, %v757_v39 }
  0xb6   :  { %235 = vmatmul.f32.vlgmr.msra.gmra.mxu3 %v187_v42  ;;  %v180_v43 = vmul.f32 %v759_v41, %v759_v41 }
  0xb7   :  { %v126_v44 = vpop.f32.mrf.mxu2 }
  0xb8   :  { %v156_v45 = vmul.f32 0.03125, %v126_v44  ;;  %214 = vmatmul.f32.gmra.mxu1 %v180_v43 }
  0xb9   :  { %v105_v46 = vpop.f32.mrf.mxu0 }
  0xba   :  { %v765_v47 = vsub.f32 %v59_v19, %v156_v45  ;;  %v149_v48 = vmul.f32 0.03125, %v105_v46 }
  0xbc   :  { %v767_v49 = vsub.f32 %v52_v20, %v149_v48  ;;  %v188_v50 = vmul.f32 %v765_v47, %v765_v47 }
  0xbe   :  { %238 = vmatmul.f32.gmra.mxu3 %v188_v50  ;;  %v181_v51 = vmul.f32 %v767_v49, %v767_v49 }
  0xbf   :  { %v129_v52 = vpop.f32.mrf.mxu2 }
  0xc0   :  { %v157_v53 = vmul.f32 0.03125, %v129_v52  ;;  %217 = vmatmul.f32.gmra.mxu1 %v181_v51 }
  0xc1   :  { %v108_v54 = vpop.f32.mrf.mxu0 }
  0xc2   :  { %v773_v55 = vsub.f32 %v60_v21, %v157_v53  ;;  %v150_v56 = vmul.f32 0.03125, %v108_v54 }
  0xc4   :  { %v775_v57 = vsub.f32 %v53_v22, %v150_v56  ;;  %v189_v58 = vmul.f32 %v773_v55, %v773_v55 }
  0xc6   :  { %241 = vmatmul.f32.gmra.mxu3 %v189_v58  ;;  %v182_v59 = vmul.f32 %v775_v57, %v775_v57 }
  0xc7   :  { %v132_v60 = vpop.f32.mrf.mxu2 }
  0xc8   :  { %v158_v61 = vmul.f32 0.03125, %v132_v60  ;;  %220 = vmatmul.f32.gmra.mxu1 %v182_v59  ;;  %v828_v60 = vld [vmem:[%s959_s2] ss:$0 sm:$0xff]  ;;  %s697_s2 = smov [#allocation7]  }
  0xc9   :  { %v111_v62 = vpop.f32.mrf.mxu0 }
  0xca   :  { %v781_v63 = vsub.f32 %v61_v23, %v158_v61  ;;  %v151_v0 = vmul.f32 0.03125, %v111_v62 }
  0xcc   :  { %v783_v1 = vsub.f32 %v54_v24, %v151_v0  ;;  %v190_v2 = vmul.f32 %v781_v63, %v781_v63 }
  0xce   :  { %244 = vmatmul.f32.gmra.mxu3 %v190_v2  ;;  %v183_v3 = vmul.f32 %v783_v1, %v783_v1 }
  0xcf   :  { %v135_v4 = vpop.f32.mrf.mxu2 }
  0xd0   :  { %v159_v5 = vmul.f32 0.03125, %v135_v4  ;;  %223 = vmatmul.f32.gmra.mxu1 %v183_v3  ;;  %v835_v4 = vld [vmem:[%s960_s3] ss:$0 sm:$0xff]  ;;  %s528_s3 = sshll.u32 %s697_s2, 4  ;;  %s529_s3 = int_to_ptr.vmem [resolvable:$true] %s528_s3 }
  0xd1   :  { %v114_v6 = vpop.f32.mrf.mxu0 }
  0xd2   :  { %v790_v7 = vsub.f32 %v735_v25, %v159_v5  ;;  %v152_v8 = vmul.f32 0.03125, %v114_v6 }
  0xd4   :  { %v792_v9 = vsub.f32 %v55_v26, %v152_v8  ;;  %v191_v10 = vmul.f32 %v790_v7, %v790_v7 }
  0xd6   :  { %247 = vmatmul.f32.gmra.mxu3 %v191_v10  ;;  %v184_v11 = vmul.f32 %v792_v9, %v792_v9 }
  0xd7   :  { %v138_v12 = vpop.f32.mrf.mxu2 }
  0xd8   :  { %v160_v13 = vmul.f32 0.03125, %v138_v12  ;;  %226 = vmatmul.f32.gmra.mxu1 %v184_v11 }
  0xd9   :  { %v117_v14 = vpop.f32.mrf.mxu0 }
  0xda   :  { %v799_v15 = vsub.f32 %v738_v27, %v160_v13  ;;  %v153_v16 = vmul.f32 0.03125, %v117_v14 }
  0xdc   :  { %v802_v17 = vsub.f32 %v741_v28, %v153_v16  ;;  %v192_v18 = vmul.f32 %v799_v15, %v799_v15 }
  0xde   :  { %250 = vmatmul.f32.gmra.mxu3 %v192_v18  ;;  %v185_v19 = vmul.f32 %v802_v17, %v802_v17 }
  0xdf   :  { %v141_v20 = vpop.f32.mrf.mxu2 }
  0xe0   :  { %v161_v21 = vmul.f32 0.03125, %v141_v20  ;;  %229 = vmatmul.f32.gmra.mxu1 %v185_v19 }
  0xe1   :  { %v120_v22 = vpop.f32.mrf.mxu0 }
  0xe2   :  { %v809_v23 = vsub.f32 %v743_v29, %v161_v21  ;;  %v154_v24 = vmul.f32 0.03125, %v120_v22 }
  0xe4   :  { %v812_v25 = vsub.f32 %v747_v30, %v154_v24  ;;  %v193_v26 = vmul.f32 %v809_v23, %v809_v23 }
  0xe6   :  { %253 = vmatmul.f32.gmra.mxu3 %v193_v26  ;;  %v186_v27 = vmul.f32 %v812_v25, %v812_v25 }
  0xe7   :  { %v144_v28 = vpop.f32.mrf.mxu2 }
  0xe8   :  { %v162_v32 = vmul.f32 0.03125, %v144_v28  ;;  %232 = vmatmul.f32.gmra.mxu1 %v186_v27 }
  0xea   :  { %v819_v33 = vsub.f32 %v749_v31, %v162_v32 }
  0xec   :  { %v194_v29 = vmul.f32 %v819_v33, %v819_v33 }
  0xee   :  { %256 = vmatmul.f32.gmra.mxu3 %v194_v29 }
 0x12d   :  { %v212_v35 = vpop.f32.mrf.mxu1 }
 0x12e   :  { %v260_v30 = vmul.f32 0.03125, %v212_v35 }
 0x130   :  { %v276_v36 = vadd.f32 1e-06, %v260_v30 }
 0x132   :  { %583 = vrsqrt.f32 %v276_v36  ;;  %vm298_vm0 = vweird.f32 %v276_v36 }
 0x135   :  { %v215_v37 = vpop.f32.mrf.mxu1 }
 0x136   :  { %v261_v38 = vmul.f32 0.03125, %v215_v37 }
 0x138   :  { %v584_v40 = vpop.eup %583  ;;  %v277_v42 = vadd.f32 1e-06, %v261_v38 }
 0x139   :  { %v293_v43 = vmul.f32 %v584_v40, %v276_v36  ;;  %v236_v44 = vpop.f32.mrf.mxu3  ;;  %vm299_vm1 = vweird.f32 %v584_v40 }
 0x13a   :  { %585 = vrsqrt.f32 %v277_v42  ;;  %v268_v45 = vmul.f32 0.03125, %v236_v44  ;;  %vm300_vm2 = vmor %vm298_vm0, %vm299_vm1  ;;  %vm308_vm3 = vweird.f32 %v277_v42 }
 0x13b   :  { %v294_v46 = vmul.f32 %v584_v40, %v293_v43 }
 0x13c   :  { %v284_v48 = vadd.f32 1e-06, %v268_v45 }
 0x13d   :  { %v295_v31 = vmul.f32 0.5, %v294_v46  ;;  %v218_v50 = vpop.f32.mrf.mxu1 }
 0x13e   :  { %587 = vrsqrt.f32 %v284_v48  ;;  %v262_v51 = vmul.f32 0.03125, %v218_v50  ;;  %vm378_vm7 = vweird.f32 %v284_v48 }
 0x13f   :  { %v296_v52 = vsub.f32 1.5, %v295_v31 }
 0x140   :  { %v586_v53 = vpop.eup %585  ;;  %v823_v54 = vadd.f32 1e-06, %v262_v51 }
 0x141   :  { %v297_v56 = vmul.f32 %v584_v40, %v296_v52  ;;  %v303_v58 = vmul.f32 %v586_v53, %v277_v42  ;;  %v239_v59 = vpop.f32.mrf.mxu3  ;;  %vm309_vm4 = vweird.f32 %v586_v53 }
 0x142   :  { %589 = vrsqrt.f32 %v823_v54  ;;  %v269_v61 = vmul.f32 0.03125, %v239_v59  ;;  %vm310_vm5 = vmor %vm308_vm3, %vm309_vm4  ;;  %vm318_vm9 = vweird.f32 %v823_v54 }
 0x143   :  { %v301_v62 = vsel %vm300_vm2, %v584_v40, %v297_v56  ;;  %v304_v0 = vmul.f32 %v586_v53, %v303_v58 }
 0x144   :  { %v588_v2 = vpop.eup %587  ;;  %v452_v3 = vmul.f32 %v301_v62, %v753_v34  ;;  %v837_v5 = vadd.f32 1e-06, %v269_v61 }
 0x145   :  { %v305_v6 = vmul.f32 0.5, %v304_v0  ;;  %v373_v8 = vmul.f32 %v588_v2, %v284_v48  ;;  %v221_v10 = vpop.f32.mrf.mxu1  ;;  %vm379_vm6 = vweird.f32 %v588_v2 }
 0x146   :  { %v472_v11 = vmul.f32 %v828_v60, %v452_v3  ;;  %591 = vrsqrt.f32 %v837_v5  ;;  %v263_v12 = vmul.f32 0.03125, %v221_v10  ;;  %vm380_vm8 = vmor %vm378_vm7, %vm379_vm6  ;;  %vm388_vm13 = vweird.f32 %v837_v5 }
 0x147   :  { %v306_v13 = vsub.f32 1.5, %v305_v6  ;;  %v374_v14 = vmul.f32 %v588_v2, %v373_v8 }
 0x148   :  { %v590_v34 = vpop.eup %589  ;;  %v492_v16 = vadd.f32 %v835_v4, %v472_v11  ;;  %v842_v18 = vadd.f32 1e-06, %v263_v12 }
 0x149   :  { %v307_v19 = vmul.f32 %v586_v53, %v306_v13  ;;  %v375_v20 = vmul.f32 0.5, %v374_v14  ;;  %v313_v21 = vmul.f32 %v590_v34, %v823_v54  ;;  %v242_v22 = vpop.f32.mrf.mxu3  ;;  %vm319_vm10 = vweird.f32 %v590_v34 }
 0x14a   :  { %508 = vst [vmem:[#allocation7] sm:$0xff] %v492_v16  ;;  %593 = vrsqrt.f32 %v842_v18  ;;  %v270_v24 = vmul.f32 0.03125, %v242_v22  ;;  %vm320_vm11 = vmor %vm318_vm9, %vm319_vm10  ;;  %vm328_vm15 = vweird.f32 %v842_v18 }
 0x14b   :  { %v311_v26 = vsel %vm310_vm5, %v586_v53, %v307_v19  ;;  %v376_v27 = vsub.f32 1.5, %v375_v20  ;;  %v314_v28 = vmul.f32 %v590_v34, %v313_v21 }
 0x14c   :  { %v592_v32 = vpop.eup %591  ;;  %v453_v29 = vmul.f32 %v311_v26, %v759_v41  ;;  %v847_v35 = vadd.f32 1e-06, %v270_v24 }
 0x14d   :  { %v377_v30 = vmul.f32 %v588_v2, %v376_v27  ;;  %v315_v36 = vmul.f32 0.5, %v314_v28  ;;  %v383_v37 = vmul.f32 %v592_v32, %v837_v5  ;;  %v224_v38 = vpop.f32.mrf.mxu1  ;;  %vm389_vm12 = vweird.f32 %v592_v32 }
 0x14e   :  { %v473_v40 = vmul.f32 %v828_v60, %v453_v29  ;;  %595 = vrsqrt.f32 %v847_v35  ;;  %v264_v42 = vmul.f32 0.03125, %v224_v38  ;;  %vm390_vm14 = vmor %vm388_vm13, %vm389_vm12  ;;  %vm398_vm3 = vweird.f32 %v847_v35 }
 0x14f   :  { %v381_v43 = vsel %vm380_vm8, %v588_v2, %v377_v30  ;;  %v316_v44 = vsub.f32 1.5, %v315_v36  ;;  %v384_v41 = vmul.f32 %v592_v32, %v383_v37 }
 0x150   :  { %v594_v45 = vpop.eup %593  ;;  %v493_v46 = vadd.f32 %v835_v4, %v473_v40  ;;  %v460_v48 = vmul.f32 %v381_v43, %v757_v39  ;;  %v855_v31 = vadd.f32 1e-06, %v264_v42 }
 0x151   :  { %v317_v50 = vmul.f32 %v590_v34, %v316_v44  ;;  %v385_v51 = vmul.f32 0.5, %v384_v41  ;;  %v323_v52 = vmul.f32 %v594_v45, %v842_v18  ;;  %v245_v53 = vpop.f32.mrf.mxu3  ;;  %vm329_vm0 = vweird.f32 %v594_v45 }
 0x152   :  { %509 = vst [vmem:[#allocation7 + $0x8] sm:$0xff] %v493_v46  ;;  %v480_v56 = vmul.f32 %v828_v60, %v460_v48  ;;  %597 = vrsqrt.f32 %v855_v31  ;;  %v271_v58 = vmul.f32 0.03125, %v245_v53  ;;  %vm330_vm1 = vmor %vm328_vm15, %vm329_vm0  ;;  %vm338_vm5 = vweird.f32 %v855_v31 }
 0x153   :  { %v321_v59 = vsel %vm320_vm11, %v590_v34, %v317_v50  ;;  %v386_v61 = vsub.f32 1.5, %v385_v51  ;;  %v324_v39 = vmul.f32 %v594_v45, %v323_v52 }
 0x154   :  { %v596_v62 = vpop.eup %595  ;;  %v500_v0 = vadd.f32 %v835_v4, %v480_v56  ;;  %v454_v2 = vmul.f32 %v321_v59, %v767_v49  ;;  %v864_v3 = vadd.f32 1e-06, %v271_v58 }
 0x155   :  { %v387_v6 = vmul.f32 %v592_v32, %v386_v61  ;;  %v325_v8 = vmul.f32 0.5, %v324_v39  ;;  %v393_v54 = vmul.f32 %v596_v62, %v847_v35  ;;  %v227_v10 = vpop.f32.mrf.mxu1  ;;  %vm399_vm2 = vweird.f32 %v596_v62 }
 0x156   :  { %516 = vst [vmem:[#allocation7 + $0x40] sm:$0xff] %v500_v0  ;;  %v474_v11 = vmul.f32 %v828_v60, %v454_v2  ;;  %599 = vrsqrt.f32 %v864_v3  ;;  %v265_v12 = vmul.f32 0.03125, %v227_v10  ;;  %vm400_vm4 = vmor %vm398_vm3, %vm399_vm2  ;;  %vm408_vm9 = vweird.f32 %v864_v3 }
 0x157   :  { %v391_v13 = vsel %vm390_vm14, %v592_v32, %v387_v6  ;;  %v326_v49 = vsub.f32 1.5, %v325_v8  ;;  %v394_v14 = vmul.f32 %v596_v62, %v393_v54 }
 0x158   :  { %v598_v34 = vpop.eup %597  ;;  %v494_v5 = vadd.f32 %v835_v4, %v474_v11  ;;  %v461_v16 = vmul.f32 %v391_v13, %v765_v47  ;;  %v873_v19 = vadd.f32 1e-06, %v265_v12 }
 0x159   :  { %v327_v20 = vmul.f32 %v594_v45, %v326_v49  ;;  %v395_v21 = vmul.f32 0.5, %v394_v14  ;;  %v333_v22 = vmul.f32 %v598_v34, %v855_v31  ;;  %v248_v24 = vpop.f32.mrf.mxu3  ;;  %vm339_vm6 = vweird.f32 %v598_v34 }
 0x15a   :  { %510 = vst [vmem:[#allocation7 + $0x10] sm:$0xff] %v494_v5  ;;  %v481_v26 = vmul.f32 %v828_v60, %v461_v16  ;;  %601 = vrsqrt.f32 %v873_v19  ;;  %v272_v27 = vmul.f32 0.03125, %v248_v24  ;;  %vm340_vm7 = vmor %vm338_vm5, %vm339_vm6  ;;  %vm348_vm11 = vweird.f32 %v873_v19 }
 0x15b   :  { %v331_v28 = vsel %vm330_vm1, %v594_v45, %v327_v20  ;;  %v396_v32 = vsub.f32 1.5, %v395_v21  ;;  %v334_v47 = vmul.f32 %v598_v34, %v333_v22 }
 0x15c   :  { %v600_v29 = vpop.eup %599  ;;  %v501_v30 = vadd.f32 %v835_v4, %v481_v26  ;;  %v455_v36 = vmul.f32 %v331_v28, %v775_v57  ;;  %v882_v37 = vadd.f32 1e-06, %v272_v27 }
 0x15d   :  { %v397_v38 = vmul.f32 %v596_v62, %v396_v32  ;;  %v335_v40 = vmul.f32 0.5, %v334_v47  ;;  %v403_v18 = vmul.f32 %v600_v29, %v864_v3  ;;  %v230_v42 = vpop.f32.mrf.mxu1  ;;  %vm409_vm8 = vweird.f32 %v600_v29 }
 0x15e   :  { %517 = vst [vmem:[#allocation7 + $0x48] sm:$0xff] %v501_v30  ;;  %v475_v43 = vmul.f32 %v828_v60, %v455_v36  ;;  %603 = vrsqrt.f32 %v882_v37  ;;  %v266_v44 = vmul.f32 0.03125, %v230_v42  ;;  %vm410_vm10 = vmor %vm408_vm9, %vm409_vm8  ;;  %vm418_vm15 = vweird.f32 %v882_v37 }
 0x15f   :  { %v401_v41 = vsel %vm400_vm4, %v596_v62, %v397_v38  ;;  %v336_v57 = vsub.f32 1.5, %v335_v40  ;;  %v404_v45 = vmul.f32 %v600_v29, %v403_v18 }
 0x160   :  { %v602_v46 = vpop.eup %601  ;;  %v495_v35 = vadd.f32 %v835_v4, %v475_v43  ;;  %v462_v48 = vmul.f32 %v401_v41, %v773_v55  ;;  %v891_v50 = vadd.f32 1e-06, %v266_v44 }
 0x161   :  { %v337_v51 = vmul.f32 %v598_v34, %v336_v57  ;;  %v405_v52 = vmul.f32 0.5, %v404_v45  ;;  %v343_v53 = vmul.f32 %v602_v46, %v873_v19  ;;  %v251_v56 = vpop.f32.mrf.mxu3  ;;  %vm349_vm12 = vweird.f32 %v602_v46 }
 0x162   :  { %511 = vst [vmem:[#allocation7 + $0x18] sm:$0xff] %v495_v35  ;;  %v482_v58 = vmul.f32 %v828_v60, %v462_v48  ;;  %605 = vrsqrt.f32 %v891_v50  ;;  %v273_v59 = vmul.f32 0.03125, %v251_v56  ;;  %vm350_vm13 = vmor %vm348_vm11, %vm349_vm12  ;;  %vm358_vm1 = vweird.f32 %v891_v50 }
 0x163   :  { %v341_v61 = vsel %vm340_vm7, %v598_v34, %v337_v51  ;;  %v406_v39 = vsub.f32 1.5, %v405_v52  ;;  %v344_v55 = vmul.f32 %v602_v46, %v343_v53 }
 0x164   :  { %v604_v62 = vpop.eup %603  ;;  %v502_v0 = vadd.f32 %v835_v4, %v482_v58  ;;  %v456_v2 = vmul.f32 %v341_v61, %v783_v1  ;;  %v900_v6 = vadd.f32 1e-06, %v273_v59 }
 0x165   :  { %v407_v8 = vmul.f32 %v600_v29, %v406_v39  ;;  %v345_v54 = vmul.f32 0.5, %v344_v55  ;;  %v413_v31 = vmul.f32 %v604_v62, %v882_v37  ;;  %v233_v10 = vpop.f32.mrf.mxu1  ;;  %vm419_vm14 = vweird.f32 %v604_v62 }
 0x166   :  { %518 = vst [vmem:[#allocation7 + $0x50] sm:$0xff] %v502_v0  ;;  %v476_v11 = vmul.f32 %v828_v60, %v456_v2  ;;  %607 = vrsqrt.f32 %v900_v6  ;;  %v267_v12 = vmul.f32 0.03125, %v233_v10  ;;  %vm420_vm0 = vmor %vm418_vm15, %vm419_vm14  ;;  %vm428_vm5 = vweird.f32 %v900_v6 }
 0x167   :  { %v411_v13 = vsel %vm410_vm10, %v600_v29, %v407_v8  ;;  %v346_v1 = vsub.f32 1.5, %v345_v54  ;;  %v414_v49 = vmul.f32 %v604_v62, %v413_v31 }
 0x168   :  { %v606_v14 = vpop.eup %605  ;;  %v496_v3 = vadd.f32 %v835_v4, %v476_v11  ;;  %v463_v34 = vmul.f32 %v411_v13, %v781_v63  ;;  %v909_v5 = vadd.f32 1e-06, %v267_v12 }
 0x169   :  { %v347_v16 = vmul.f32 %v602_v46, %v346_v1  ;;  %v415_v20 = vmul.f32 0.5, %v414_v49  ;;  %v353_v21 = vmul.f32 %v606_v14, %v891_v50  ;;  %v254_v22 = vpop.f32.mrf.mxu3  ;;  %vm359_vm2 = vweird.f32 %v606_v14 }
 0x16a   :  { %512 = vst [vmem:[#allocation7 + $0x20] sm:$0xff] %v496_v3  ;;  %v483_v24 = vmul.f32 %v828_v60, %v463_v34  ;;  %609 = vrsqrt.f32 %v909_v5  ;;  %v274_v26 = vmul.f32 0.03125, %v254_v22  ;;  %vm360_vm3 = vmor %vm358_vm1, %vm359_vm2  ;;  %vm368_vm7 = vweird.f32 %v909_v5 }
 0x16b   :  { %v351_v27 = vsel %vm350_vm13, %v602_v46, %v347_v16  ;;  %v416_v28 = vsub.f32 1.5, %v415_v20  ;;  %v354_v63 = vmul.f32 %v606_v14, %v353_v21 }
 0x16c   :  { %v608_v32 = vpop.eup %607  ;;  %v503_v47 = vadd.f32 %v835_v4, %v483_v24  ;;  %v457_v29 = vmul.f32 %v351_v27, %v792_v9  ;;  %v918_v30 = vadd.f32 1e-06, %v274_v26 }
 0x16d   :  { %v417_v36 = vmul.f32 %v604_v62, %v416_v28  ;;  %v355_v38 = vmul.f32 0.5, %v354_v63  ;;  %v423_v19 = vmul.f32 %v608_v32, %v900_v6  ;;  %vm429_vm4 = vweird.f32 %v608_v32 }
 0x16e   :  { %519 = vst [vmem:[#allocation7 + $0x58] sm:$0xff] %v503_v47  ;;  %v477_v40 = vmul.f32 %v828_v60, %v457_v29  ;;  %611 = vrsqrt.f32 %v918_v30  ;;  %vm430_vm6 = vmor %vm428_vm5, %vm429_vm4  ;;  %vm438_vm11 = vweird.f32 %v918_v30 }
 0x16f   :  { %v421_v18 = vsel %vm420_vm0, %v604_v62, %v417_v36  ;;  %v356_v42 = vsub.f32 1.5, %v355_v38  ;;  %v424_v9 = vmul.f32 %v608_v32, %v423_v19 }
 0x170   :  { %v610_v43 = vpop.eup %609  ;;  %v497_v44 = vadd.f32 %v835_v4, %v477_v40  ;;  %v464_v37 = vmul.f32 %v421_v18, %v790_v7 }
 0x171   :  { %v357_v41 = vmul.f32 %v606_v14, %v356_v42  ;;  %v425_v57 = vmul.f32 0.5, %v424_v9  ;;  %v363_v45 = vmul.f32 %v610_v43, %v909_v5  ;;  %v257_v46 = vpop.f32.mrf.mxu3  ;;  %vm369_vm8 = vweird.f32 %v610_v43 }
 0x172   :  { %513 = vst [vmem:[#allocation7 + $0x28] sm:$0xff] %v497_v44  ;;  %v484_v35 = vmul.f32 %v828_v60, %v464_v37  ;;  %v275_v48 = vmul.f32 0.03125, %v257_v46  ;;  %vm370_vm9 = vmor %vm368_vm7, %vm369_vm8 }
 0x173   :  { %v361_v51 = vsel %vm360_vm3, %v606_v14, %v357_v41  ;;  %v426_v52 = vsub.f32 1.5, %v425_v57  ;;  %v364_v53 = vmul.f32 %v610_v43, %v363_v45 }
 0x174   :  { %v612_v56 = vpop.eup %611  ;;  %v504_v58 = vadd.f32 %v835_v4, %v484_v35  ;;  %v458_v7 = vmul.f32 %v361_v51, %v802_v17  ;;  %v291_v59 = vadd.f32 1e-06, %v275_v48 }
 0x175   :  { %v427_v61 = vmul.f32 %v608_v32, %v426_v52  ;;  %v365_v39 = vmul.f32 0.5, %v364_v53  ;;  %v433_v55 = vmul.f32 %v612_v56, %v918_v30  ;;  %vm439_vm10 = vweird.f32 %v612_v56 }
 0x176   :  { %520 = vst [vmem:[#allocation7 + $0x60] sm:$0xff] %v504_v58  ;;  %v478_v50 = vmul.f32 %v828_v60, %v458_v7  ;;  %613 = vrsqrt.f32 %v291_v59  ;;  %vm440_vm12 = vmor %vm438_vm11, %vm439_vm10  ;;  %vm448_vm14 = vweird.f32 %v291_v59 }
 0x177   :  { %v431_v62 = vsel %vm430_vm6, %v608_v32, %v427_v61  ;;  %v366_v0 = vsub.f32 1.5, %v365_v39  ;;  %v434_v2 = vmul.f32 %v612_v56, %v433_v55 }
 0x178   :  { %v498_v17 = vadd.f32 %v835_v4, %v478_v50  ;;  %v465_v8 = vmul.f32 %v431_v62, %v799_v15 }
 0x179   :  { %v367_v54 = vmul.f32 %v610_v43, %v366_v0  ;;  %v435_v6 = vmul.f32 0.5, %v434_v2 }
 0x17a   :  { %514 = vst [vmem:[#allocation7 + $0x30] sm:$0xff] %v498_v17  ;;  %v485_v31 = vmul.f32 %v828_v60, %v465_v8 }
 0x17b   :  { %v371_v10 = vsel %vm370_vm9, %v610_v43, %v367_v54  ;;  %v436_v11 = vsub.f32 1.5, %v435_v6 }
 0x17c   :  { %v614_v12 = vpop.eup %613  ;;  %v505_v13 = vadd.f32 %v835_v4, %v485_v31  ;;  %v459_v1 = vmul.f32 %v371_v10, %v812_v25 }
 0x17d   :  { %v437_v49 = vmul.f32 %v612_v56, %v436_v11  ;;  %v443_v14 = vmul.f32 %v614_v12, %v291_v59  ;;  %vm449_vm13 = vweird.f32 %v614_v12 }
 0x17e   :  { %521 = vst [vmem:[#allocation7 + $0x68] sm:$0xff] %v505_v13  ;;  %v479_v15 = vmul.f32 %v828_v60, %v459_v1  ;;  %vm450_vm15 = vmor %vm448_vm14, %vm449_vm13 }
 0x17f   :  { %v441_v3 = vsel %vm440_vm12, %v612_v56, %v437_v49  ;;  %v444_v34 = vmul.f32 %v614_v12, %v443_v14 }
 0x180   :  { %v499_v5 = vadd.f32 %v835_v4, %v479_v15  ;;  %v466_v16 = vmul.f32 %v441_v3, %v809_v23 }
 0x181   :  { %v445_v20 = vmul.f32 0.5, %v444_v34 }
 0x182   :  { %515 = vst [vmem:[#allocation7 + $0x38] sm:$0xff] %v499_v5  ;;  %v486_v21 = vmul.f32 %v828_v60, %v466_v16 }
 0x183   :  { %v446_v22 = vsub.f32 1.5, %v445_v20 }
 0x184   :  { %v506_v25 = vadd.f32 %v835_v4, %v486_v21 }
 0x185   :  { %v447_v24 = vmul.f32 %v614_v12, %v446_v22 }
 0x186   :  { %522 = vst [vmem:[#allocation7 + $0x70] sm:$0xff] %v506_v25 }
 0x187   :  { %v451_v26 = vsel %vm450_vm15, %v614_v12, %v447_v24 }
 0x188   :  { %v467_v27 = vmul.f32 %v451_v26, %v819_v33 }
 0x18a   :  { %v487_v23 = vmul.f32 %v828_v60, %v467_v27 }
 0x18c   :  { %v507_v28 = vadd.f32 %v835_v4, %v487_v23 }
 0x18e   :  { %523 = vst [vmem:[#allocation7 + $0x78] sm:$0xff] %v507_v28 }
 0x18f   :  { %536 = dma.vmem_to_hbm [thread:$0]  %s529_s3, 2048, %s531_s5, [#allocation4], %s694_s23, %s694_s23, %s695_s24  }
 0x190   :  { %691 = dma.done.wait [#allocation4], 2048  }
 0x191   :  { %692 = vsyncadd [#allocation4], 4294965248 }
 0x192   :  { %541 = vsyncpa [#allocation3], 1 }
 0x193   :  { %542 = vsyncpa [#allocation6], 1 }
 0x194   :  { %543 = vsyncpa [#allocation4], 1 }

</bundles_post_ra>
